<compile_context>
chip_gen: v7x
topology: tpu7x:2x2x1
jax: 0.10.0
libtpu: 0.0.40
codegen_flags: <defaults>
</compile_context>

<pallas_src>
import jax
import jax.numpy as jnp
from jax.experimental import pallas as pl
from jax.experimental.pallas import tpu as pltpu

_LANE = 128
_ROW_BLOCK = 1024  # batch tiles are multiples of this whenever the grid has > 1 step


def _round_up(a, b):
    return ((a + b - 1) // b) * b


def _cdiv(a, b):
    return -(-a // b)


def listnet_kernel(x_ref, w1_ref, b1_ref, w2_ref, b2_ref, o_ref):
    # hidden = relu(x @ W1 + b1): MXU matmul (bf16 or f32 operands, f32 accumulation)
    # followed by VPU elementwise ops in f32.
    h = jnp.dot(x_ref[...], w1_ref[...], preferred_element_type=jnp.float32)
    h = jnp.maximum(h + b1_ref[...], 0.0)                 # b1 is (1, H), broadcasts over rows
    # logits = h @ w2 + b2 with w2 of width 1: VPU multiply + lane-axis (XLU) sum
    # instead of an N=1 MXU matmul (which would waste >99% of the systolic array).
    scores = jnp.sum(h * w2_ref[...], axis=-1) + b2_ref[0]            # (TM,), f32
    # Lane-dense store: (TM,) -> (TM // 128, 128) full vregs (no masked partial stores).
    o_ref[...] = scores.reshape(o_ref.shape).astype(o_ref.dtype)


def listnet_forward(x, w1, b1, w2, b2, *, max_tile=4096, use_bf16_inputs=True):
    n, f = x.shape
    hidden = w1.shape[1]

    # Keep tiles a multiple of 1024 rows when the grid can have > 1 step so the output
    # block's second-to-last dim (tm/128) stays a multiple of 8 -> full-vreg stores.
    max_tile = _round_up(max(int(max_tile), _ROW_BLOCK), _ROW_BLOCK)

    if n <= _ROW_BLOCK:
        # Single grid step: the output block equals the full (padded) array, so any
        # 128-multiple row count is a legal block shape.
        tm = _round_up(max(n, 1), _LANE)
    else:
        # >= 2 grid steps so v7x's two TensorCores both get work; cap at max_tile.
        tm = min(max_tile, _round_up(_cdiv(n, 2), _ROW_BLOCK))

    num_steps = _cdiv(n, tm)
    blk_rows = tm // _LANE
    out_rows = num_steps * blk_rows  # padded output rows-of-128; real rows sliced below

    # dtype handling: bf16 MXU operands (halves the dominant x HBM stream); everything
    # after the first matmul stays f32.
    compute_dtype = jnp.bfloat16 if use_bf16_inputs else jnp.float32
    x_in = x if x.dtype == compute_dtype else x.astype(compute_dtype)
    w1_in = w1 if w1.dtype == compute_dtype else w1.astype(compute_dtype)
    b1_row = b1.reshape(1, hidden).astype(jnp.float32)
    w2_row = w2.reshape(1, hidden).astype(jnp.float32)    # (1, H) for the VPU reduce
    b2_s = b2.reshape(1).astype(jnp.float32)              # scalar bias -> SMEM

    # Explicit VMEM budget: v5e default scoped VMEM is 16 MiB, v7x physical is 64 MiB.
    xb = jnp.dtype(compute_dtype).itemsize
    budget = (3 * tm * f * xb                 # x pipeline buffers (headroom for depth 3)
              + 2 * f * hidden * xb           # resident W1 (allocated double-buffered)
              + 2 * 2 * hidden * 4            # b1 + w2 rows
              + 2 * blk_rows * _LANE * 4      # output double buffer
              + 2 * tm * hidden * 4)          # hidden intermediate / temporaries
    vmem_limit = int(min(64 << 20, max(32 << 20, 2 * budget)))

    out = pl.pallas_call(
        listnet_kernel,
        out_shape=jax.ShapeDtypeStruct((out_rows, _LANE), jnp.float32),
        grid=(num_steps,),
        in_specs=[
            pl.BlockSpec((tm, f), lambda i: (i, 0)),             # stream x per tile
            pl.BlockSpec((f, hidden), lambda i: (0, 0)),         # W1 resident
            pl.BlockSpec((1, hidden), lambda i: (0, 0)),         # b1 resident
            pl.BlockSpec((1, hidden), lambda i: (0, 0)),         # w2 row resident
            pl.BlockSpec(memory_space=pltpu.MemorySpace.SMEM),   # b2 scalar in SMEM
        ],
        out_specs=pl.BlockSpec((blk_rows, _LANE), lambda i: (i, 0)),
        compiler_params=pltpu.CompilerParams(
            dimension_semantics=("parallel",),
            vmem_limit_bytes=vmem_limit,
        ),
    )(x_in, w1_in, b1_row, w2_row, b2_s)

    # (out_rows, 128) row-major flattens back to the original batch order; rows past n
    # (ragged last block / lane padding) are garbage and are sliced off here.
    return out.reshape(num_steps * tm, 1)[:n]


def init_params(key, num_input_features, hidden_dim):
    # Deterministic init mimicking torch.nn.Linear default (uniform +- 1/sqrt(fan_in)).
    k1, k2, k3, k4 = jax.random.split(key, 4)
    bound1 = 1.0 / jnp.sqrt(num_input_features)
    bound2 = 1.0 / jnp.sqrt(hidden_dim)
    w1 = jax.random.uniform(k1, (num_input_features, hidden_dim),
                            minval=-bound1, maxval=bound1, dtype=jnp.float32)
    b1 = jax.random.uniform(k2, (1, hidden_dim),
                            minval=-bound1, maxval=bound1, dtype=jnp.float32)
    w2 = jax.random.uniform(k3, (hidden_dim, 1),
                            minval=-bound2, maxval=bound2, dtype=jnp.float32)
    b2 = jax.random.uniform(k4, (1, 1),
                            minval=-bound2, maxval=bound2, dtype=jnp.float32)
    return w1, b1, w2, b2


if __name__ == "__main__":
    num_input_features = 32
    hidden_dim = 32
    batch = 8  # e.g. number of documents in a list

    key = jax.random.PRNGKey(0)
    kx, kp, kx2 = jax.random.split(key, 3)
    x = jax.random.normal(kx, (batch, num_input_features), dtype=jnp.float32)
    w1, b1, w2, b2 = init_params(kp, num_input_features, hidden_dim)

    ref = jnp.maximum(x @ w1 + b1, 0.0) @ w2 + b2

    # Exact f32 path (single ragged tile, no padding of x).
    logits_f32 = jax.block_until_ready(
        listnet_forward(x, w1, b1, w2, b2, use_bf16_inputs=False))
    assert logits_f32.shape == (batch, 1)
    assert jnp.allclose(logits_f32, ref, atol=1e-5, rtol=1e-5)

    # Default bf16-MXU-operand path (f32 accumulation) -- looser tolerance.
    logits_bf16 = jax.block_until_ready(listnet_forward(x, w1, b1, w2, b2))
    assert logits_bf16.shape == (batch, 1)
    assert jnp.allclose(logits_bf16, ref, atol=1e-1, rtol=1e-1)

    # Multi-step gridded path: n=2500 -> tm=2048, 2 grid steps, ragged last x block,
    # resident weights, padded-output slice.
    big = 2500
    xb = jax.random.normal(kx2, (big, num_input_features), dtype=jnp.float32)
    ref_b = jnp.maximum(xb @ w1 + b1, 0.0) @ w2 + b2

    logits_b32 = jax.block_until_ready(
        listnet_forward(xb, w1, b1, w2, b2, use_bf16_inputs=False))
    assert logits_b32.shape == (big, 1)
    assert jnp.allclose(logits_b32, ref_b, atol=1e-4, rtol=1e-4)

    logits_b16 = jax.block_until_ready(listnet_forward(xb, w1, b1, w2, b2))
    assert logits_b16.shape == (big, 1)
    assert jnp.allclose(logits_b16, ref_b, atol=1e-1, rtol=1e-1)

    print("KERNEL_OK")
</pallas_src>

<mosaic_0001>
module attributes {stable_mosaic.version = 11 : i64} {
  func.func @listnet_kernel(%arg0: i32, %arg1: memref<128x32xf32, #tpu.memory_space<vmem>>, %arg2: memref<32x32xf32, #tpu.memory_space<vmem>>, %arg3: memref<1x32xf32, #tpu.memory_space<vmem>>, %arg4: memref<1x32xf32, #tpu.memory_space<vmem>>, %arg5: memref<1xf32, #tpu.memory_space<smem>>, %arg6: memref<1x128xf32, #tpu.memory_space<vmem>>) attributes {dimension_semantics = [#tpu.dimension_semantics<parallel>], iteration_bounds = array<i64: 1>, scalar_prefetch = 0 : i64, scratch_operands = 0 : i64, tpu.core_type = #tpu.core_type<tc>, window_params = [{transform_indices = @transform_0, window_bounds = array<i64: 128, 32>}, {pipeline_mode = #tpu.pipeline_mode<synchronous>, transform_indices = @transform_1, window_bounds = array<i64: 32, 32>}, {pipeline_mode = #tpu.pipeline_mode<synchronous>, transform_indices = @transform_2, window_bounds = array<i64: 1, 32>}, {pipeline_mode = #tpu.pipeline_mode<synchronous>, transform_indices = @transform_3, window_bounds = array<i64: 1, 32>}, {transform_indices = @transform_4, window_bounds = array<i64: 1>}, {transform_indices = @transform_5, window_bounds = array<i64: 1, 128>}]} {
    %c0 = arith.constant 0 : index
    %c0_0 = arith.constant 0 : index
    %0 = vector.load %arg1[%c0, %c0_0] : memref<128x32xf32, #tpu.memory_space<vmem>>, vector<128x32xf32>
    %c0_1 = arith.constant 0 : index
    %c0_2 = arith.constant 0 : index
    %1 = vector.load %arg2[%c0_1, %c0_2] : memref<32x32xf32, #tpu.memory_space<vmem>>, vector<32x32xf32>
    %cst = arith.constant dense<0.000000e+00> : vector<128x32xf32>
    %2 = tpu.matmul %0, %1, %cst {dimension_numbers = #tpu.dot_dimension_numbers<[1], [0], [0], [1], [0, 0, 1, 1], [], []>} : vector<128x32xf32>, vector<32x32xf32>, vector<128x32xf32> -> vector<128x32xf32>
    %c0_3 = arith.constant 0 : index
    %c0_4 = arith.constant 0 : index
    %3 = vector.load %arg3[%c0_3, %c0_4] : memref<1x32xf32, #tpu.memory_space<vmem>>, vector<1x32xf32>
    %4 = vector.broadcast %3 : vector<1x32xf32> to vector<128x32xf32>
    %5 = arith.addf %2, %4 : vector<128x32xf32>
    %cst_5 = arith.constant 0.000000e+00 : f32
    %6 = vector.broadcast %cst_5 : f32 to vector<128x32xf32>
    %7 = arith.maximumf %5, %6 : vector<128x32xf32>
    %c0_6 = arith.constant 0 : index
    %c0_7 = arith.constant 0 : index
    %8 = vector.load %arg4[%c0_6, %c0_7] : memref<1x32xf32, #tpu.memory_space<vmem>>, vector<1x32xf32>
    %9 = vector.broadcast %8 : vector<1x32xf32> to vector<128x32xf32>
    %10 = arith.mulf %7, %9 : vector<128x32xf32>
    %cst_8 = arith.constant dense<0.000000e+00> : vector<128xf32>
    %11 = vector.multi_reduction <add>, %10, %cst_8 [1] : vector<128x32xf32> to vector<128xf32>
    %c0_9 = arith.constant 0 : index
    %12 = memref.load %arg5[%c0_9] : memref<1xf32, #tpu.memory_space<smem>>
    %13 = vector.broadcast %12 : f32 to vector<128xf32>
    %14 = arith.addf %11, %13 : vector<128xf32>
    %15 = vector.shape_cast %14 : vector<128xf32> to vector<1x128xf32>
    %c0_10 = arith.constant 0 : index
    %c0_11 = arith.constant 0 : index
    %16 = vector.load %arg6[%c0_10, %c0_11] : memref<1x128xf32, #tpu.memory_space<vmem>>, vector<1x128xf32>
    tpu.vector_store %arg6[%c0_10, %c0_11], %15 {strides = array<i32>} : memref<1x128xf32, #tpu.memory_space<vmem>>, vector<1x128xf32>,
    return
  }
  func.func @transform_0(%arg0: i32) -> (i32, i32) {
    %c0_i32 = arith.constant 0 : i32
    %c0_i32_0 = arith.constant 0 : i32
    return %arg0, %c0_i32 : i32, i32
  }
  func.func @transform_1(%arg0: i32) -> (i32, i32) {
    %c0_i32 = arith.constant 0 : i32
    %c0_i32_0 = arith.constant 0 : i32
    %c0_i32_1 = arith.constant 0 : i32
    return %c0_i32, %c0_i32_0 : i32, i32
  }
  func.func @transform_2(%arg0: i32) -> (i32, i32) {
    %c0_i32 = arith.constant 0 : i32
    %c0_i32_0 = arith.constant 0 : i32
    %c0_i32_1 = arith.constant 0 : i32
    return %c0_i32, %c0_i32_0 : i32, i32
  }
  func.func @transform_3(%arg0: i32) -> (i32, i32) {
    %c0_i32 = arith.constant 0 : i32
    %c0_i32_0 = arith.constant 0 : i32
    %c0_i32_1 = arith.constant 0 : i32
    return %c0_i32, %c0_i32_0 : i32, i32
  }
  func.func @transform_4(%arg0: i32) -> i32 {
    %c0_i32 = arith.constant 0 : i32
    %c0_i32_0 = arith.constant 0 : i32
    return %c0_i32 : i32
  }
  func.func @transform_5(%arg0: i32) -> (i32, i32) {
    %c0_i32 = arith.constant 0 : i32
    %c0_i32_0 = arith.constant 0 : i32
    return %arg0, %c0_i32 : i32, i32
  }
}

</mosaic_0001>

<bundles_post_ra>
// kernel: tpu_custom_call.1
= control target key start
LH: loop header
LB: loop body
LE: loop exit
PB: predicated region body
PF: predicated region fallthrough
CT: control target
= control target key end

     0   :  { %11 = vsyncpa [#allocation4], 0  ;;  %s907_s0 = inlined_call_operand.hbm [shape: f32[8,32], index: 0, kind: input, shape index: {}]   ;;  %s908_s1 = inlined_call_operand.hbm [shape: f32[32,32], index: 1, kind: input, shape index: {}]   ;;  %s909_s2 = inlined_call_operand.vmem [shape: f32[1,32], index: 2, kind: input, shape index: {}]   ;;  %s910_s3 = inlined_call_operand.vmem [shape: f32[1,32], index: 3, kind: input, shape index: {}]   ;;  %s911_s4 = inlined_call_operand.<no memory space> [shape: f32[1], index: 4, kind: input, shape index: {}]   ;;  %s912_s5 = inlined_call_operand.hbm [shape: f32[1,128], index: 5, kind: output, shape index: {}]  }
   0x1   :  { %12 = vsyncpa [#allocation7], 0 }
   0x2   :  { %13 = vsyncpa [#allocation5], 0 }
   0x3   :  { %18 = vsyncadd [#allocation4], 1920  ;;  %s680_s18 = smov [#allocation3]   ;;  %s608_s22 = scalar_lea.hbm %s907_s0, 128 }
   0x4   :  { %s19_s19 = sshll.u32 %s680_s18, 4  ;;  %p609_p0 = scmp.ne.s32.totalorder %s907_s0, %s608_s22  ;;  %s20_s19 = int_to_ptr.vmem [resolvable:$true] %s19_s19 }
   0x5   :  { %p612_p1 = scmp.lt.u32.totalorder %s608_s22, %s907_s0 }
   0x7   :  { %p614_p2 = pnand %p612_p1, %p609_p0 }
   0x9   :  { %617 = shalt.err (!%p614_p2)
}
   0xa   :  { %s618_s27 = scalar_lea.vmem %s20_s19, 128  ;;  %s622_s28 = scalar_lea.vmem %s20_s19, 2048 }
   0xb   :  { %p619_p3 = scmp.ne.s32.totalorder %s20_s19, %s618_s27  ;;  %p623_p4 = scmp.lt.s32.totalorder %s20_s19, %s20_s19 }
   0xc   :  { %p624_p5 = scmp.lt.s32.totalorder %s622_s28, %s618_s27 }
   0xe   :  { %p625_p6 = por %p624_p5, %p623_p4 }
  0x10   :  { %p626_p7 = pnand %p625_p6, %p619_p3 }
  0x12   :  { %629 = shalt.err (!%p626_p7)
}
  0x13   :  { %s681_s29 = smov 128   ;;  %s682_s30 = smov 8  }
  0x14   :  { %25 = dma.hbm_to_vmem [thread:$0]  %s907_s0, 128, %s20_s19, [#allocation4], %s681_s29, %s681_s29, %s682_s30  }
  0x15   :  { %s683_s8 = smov [#allocation6]   ;;  %s630_s12 = scalar_lea.hbm %s908_s1, 512 }
  0x16   :  { %s31_s9 = sshll.u32 %s683_s8, 4  ;;  %p631_p8 = scmp.ne.s32.totalorder %s908_s1, %s630_s12  ;;  %s32_s9 = int_to_ptr.vmem [resolvable:$true] %s31_s9 }
  0x17   :  { %p634_p9 = scmp.lt.u32.totalorder %s630_s12, %s908_s1 }
  0x19   :  { %p636_p10 = pnand %p634_p9, %p631_p8 }
  0x1b   :  { %639 = shalt.err (!%p636_p10)
}
  0x1c   :  { %s640_s17 = scalar_lea.vmem %s32_s9, 512  ;;  %p645_p12 = scmp.lt.s32.totalorder %s32_s9, %s32_s9 }
  0x1d   :  { %p641_p11 = scmp.ne.s32.totalorder %s32_s9, %s640_s17  ;;  %p646_p13 = scmp.lt.s32.totalorder %s640_s17, %s640_s17 }
  0x1f   :  { %p647_p0 = por %p646_p13, %p645_p12 }
  0x21   :  { %p648_p1 = pnand %p647_p0, %p641_p11 }
  0x23   :  { %651 = shalt.err (!%p648_p1)
}
  0x24   :  { %37 = dma.hbm_to_vmem [thread:$0]  %s908_s1, 512, %s32_s9, [#allocation7], %s681_s29, %s681_s29, %s682_s30  }
  0x25   :  { %674 = dma.done.wait [#allocation4], 2048  }
  0x26   :  { %675 = vsyncadd [#allocation4], 4294965248 }
  0x27   :  { %676 = dma.done.wait [#allocation7], 512  }
  0x28   :  { %677 = vsyncadd [#allocation7], 4294966784  ;;  %vm77_vm0 = vcmask 261120   ;;  %v66_v0 = vld [vmem:[#allocation6] sm:$0xff]  ;;  %v67_v1 = vld [vmem:[#allocation6 + $0x8] sm:$0xff]  ;;  %vm403_vm1 = vcmask 130112  }
  0x29   :  { %v68_v2 = vld [vmem:[#allocation6 + $0x10] sm:$0xff]  ;;  %v591_v3 = vpack.c.bf16 %v67_v1, %v66_v0  ;;  %v69_v4 = vld [vmem:[#allocation6 + $0x18] sm:$0xff]  ;;  %v50_v5 = vld [vmem:[#allocation3] sm:$0xff]  ;;  %vm410_vm2 = vcmask 195712   ;;  %vm417_vm3 = vcmask 261312   ;;  %vm424_vm4 = vcmask 326912  }
  0x2a   :  { %v58_v6 = vld [vmem:[#allocation3 + $0x40] sm:$0xff]  ;;  %v595_v7 = vpack.c.bf16 %v69_v4, %v68_v2  ;;  %567 = vmatprep.mubr.msk.f32.mxu0 %vm77_vm0, %v50_v5  ;;  %v51_v8 = vld [vmem:[#allocation3 + $0x8] sm:$0xff]  ;;  %v52_v10 = vld [vmem:[#allocation3 + $0x10] sm:$0xff]  ;;  %vm431_vm5 = vcmask 392512   ;;  %vm438_vm6 = vcmask 458112   ;;  %vm445_vm7 = vcmask 523712  }
  0x2b   :  { %579 = vmatprep.mubr.msk.f32.mxu1 %vm77_vm0, %v58_v6  ;;  %592 = vmatprep.subr.bf16.mxu0 %v591_v3  ;;  %v59_v9 = vld [vmem:[#allocation3 + $0x48] sm:$0xff]  ;;  %v60_v11 = vld [vmem:[#allocation3 + $0x50] sm:$0xff]  ;;  %v53_v12 = vld [vmem:[#allocation3 + $0x18] sm:$0xff]  ;;  %vm452_vm8 = vcmask 589312   ;;  %vm459_vm9 = vcmask 654912   ;;  %vm466_vm10 = vcmask 720512  }
  0x2c   :  { %599 = vmatprep.subr.bf16.mxu1 %v591_v3  ;;  %594 = vmatpush3.bf16.msra.mxu0 %v591_v3  ;;  %v61_v13 = vld [vmem:[#allocation3 + $0x58] sm:$0xff]  ;;  %v54_v14 = vld [vmem:[#allocation3 + $0x20] sm:$0xff]  ;;  %v55_v16 = vld [vmem:[#allocation3 + $0x28] sm:$0xff]  ;;  %vm473_vm11 = vcmask 786112   ;;  %vm480_vm12 = vcmask 851712   ;;  %vm487_vm13 = vcmask 917312  }
  0x2d   :  { %601 = vmatpush3.bf16.msra.mxu1 %v591_v3  ;;  %596 = vmatprep.subr.bf16.mxu0 %v595_v7  ;;  %v62_v15 = vld [vmem:[#allocation3 + $0x60] sm:$0xff]  ;;  %v63_v17 = vld [vmem:[#allocation3 + $0x68] sm:$0xff]  ;;  %v56_v18 = vld [vmem:[#allocation3 + $0x30] sm:$0xff]  ;;  %vm494_vm14 = vcmask 982912   ;;  %vm501_vm15 = vcmask 1048512  }
  0x2e   :  { %600 = vmatprep.subr.bf16.mxu1 %v595_v7  ;;  %v64_v19 = vld [vmem:[#allocation3 + $0x70] sm:$0xff]  ;;  %v57_v20 = vld [vmem:[#allocation3 + $0x38] sm:$0xff]  ;;  %v758_v22 = vld [vmem:[%s909_s2] ss:$0 sm:$0xff] }
  0x2f   :  { %v65_v21 = vld [vmem:[#allocation3 + $0x78] sm:$0xff]  ;;  %v767_v31 = vld [vmem:[%s910_s3] ss:$0 sm:$0xff] }
  0x30   :  { %598 = vmatpush3.bf16.msra.mxu0 %v595_v7 }
  0x31   :  { %602 = vmatpush3.bf16.msra.mxu1 %v595_v7 }
  0x33   :  { %568 = vmatmul.mubr.msk.f32.vlgmr.msra.gmra.mrb[0].mxu0 %vm77_vm0, %v51_v8 }
  0x34   :  { %580 = vmatmul.mubr.msk.f32.vlgmr.msra.gmra.mrb[0].mxu1 %vm77_vm0, %v59_v9  ;;  %570 = vmatprep.mubr.msk.f32.mxu0 %vm77_vm0, %v52_v10 }
  0x35   :  { %582 = vmatprep.mubr.msk.f32.mxu1 %vm77_vm0, %v60_v11 }
  0x37   :  { %571 = vmatmul.mubr.msk.f32.gmra.mrb[2].mxu0 %vm77_vm0, %v53_v12 }
  0x38   :  { %583 = vmatmul.mubr.msk.f32.gmra.mrb[2].mxu1 %vm77_vm0, %v61_v13  ;;  %573 = vmatprep.mubr.msk.f32.mxu0 %vm77_vm0, %v54_v14 }
  0x39   :  { %585 = vmatprep.mubr.msk.f32.mxu1 %vm77_vm0, %v62_v15 }
  0x3b   :  { %574 = vmatmul.mubr.msk.f32.gmra.mrb[4].mxu0 %vm77_vm0, %v55_v16 }
  0x3c   :  { %586 = vmatmul.mubr.msk.f32.gmra.mrb[4].mxu1 %vm77_vm0, %v63_v17  ;;  %576 = vmatprep.mubr.msk.f32.mxu0 %vm77_vm0, %v56_v18 }
  0x3d   :  { %588 = vmatprep.mubr.msk.f32.mxu1 %vm77_vm0, %v64_v19 }
  0x3f   :  { %577 = vmatmul.mubr.msk.f32.gmra.mrb[6].mxu0 %vm77_vm0, %v57_v20 }
  0x40   :  { %589 = vmatmul.mubr.msk.f32.gmra.mrb[6].mxu1 %vm77_vm0, %v65_v21 }
 0x106   :  { %v569_v23 = vpop.f32.mrb[0].mxu0 }
 0x107   :  { %v581_v24 = vpop.f32.mrb[0].mxu1  ;;  %v198_v25 = vadd.f32 %v569_v23, %v758_v22  ;;  %v192_v27 = vpop.f32.mrb[1].mxu0 }
 0x108   :  { %v238_v26 = vadd.f32 %v581_v24, %v758_v22  ;;  %v232_v28 = vpop.f32.mrb[1].mxu1  ;;  %v193_v29 = vadd.f32 %v758_v22, %v192_v27 }
 0x109   :  { %v233_v30 = vadd.f32 %v758_v22, %v232_v28  ;;  %v272_v32 = vmax.f32 %v198_v25, 0.0 }
 0x10a   :  { %v280_v33 = vmax.f32 %v238_v26, 0.0  ;;  %v271_v34 = vmax.f32 %v193_v29, 0.0  ;;  %v572_v35 = vpop.f32.mrb[2].mxu0 }
 0x10b   :  { %v584_v36 = vpop.f32.mrb[2].mxu1  ;;  %v208_v37 = vadd.f32 %v572_v35, %v758_v22  ;;  %v202_v38 = vpop.f32.mrb[3].mxu0  ;;  %v295_v41 = vmul.f32 %v767_v31, %v272_v32  ;;  %v279_v43 = vmax.f32 %v233_v30, 0.0 }
 0x10c   :  { %v303_v39 = vmul.f32 %v767_v31, %v280_v33  ;;  %v248_v40 = vadd.f32 %v584_v36, %v758_v22  ;;  %v242_v42 = vpop.f32.mrb[3].mxu1  ;;  %v203_v44 = vadd.f32 %v758_v22, %v202_v38  ;;  %v294_v46 = vmul.f32 %v767_v31, %v271_v34 }
 0x10d   :  { %v243_v45 = vadd.f32 %v758_v22, %v242_v42  ;;  %v274_v47 = vmax.f32 %v208_v37, 0.0  ;;  %v313_v50 = vsel %vm77_vm0, %v295_v41, 0.0  ;;  %v302_v59 = vmul.f32 %v767_v31, %v279_v43 }
 0x10e   :  { %v337_v48 = vsel %vm77_vm0, %v303_v39, 0.0  ;;  %v282_v49 = vmax.f32 %v248_v40, 0.0  ;;  %314 = vadd.xlane.f32.xlu0 %v313_v50  ;;  %v575_v51 = vpop.f32.mrb[4].mxu0  ;;  %v273_v60 = vmax.f32 %v203_v44, 0.0  ;;  %v310_v63 = vsel %vm77_vm0, %v294_v46, 0.0 }
 0x10f   :  { %338 = vadd.xlane.f32.xlu1 %v337_v48  ;;  %v587_v52 = vpop.f32.mrb[4].mxu1  ;;  %v297_v53 = vmul.f32 %v767_v31, %v274_v47  ;;  %v218_v54 = vadd.f32 %v575_v51, %v758_v22  ;;  %v212_v55 = vpop.f32.mrb[5].mxu0  ;;  %v281_v61 = vmax.f32 %v243_v45, 0.0  ;;  %v334_v9 = vsel %vm77_vm0, %v302_v59, 0.0 }
 0x110   :  { %v305_v56 = vmul.f32 %v767_v31, %v282_v49  ;;  %v252_v57 = vpop.f32.mrb[5].mxu1  ;;  %v213_v58 = vadd.f32 %v758_v22, %v212_v55  ;;  %v296_v10 = vmul.f32 %v767_v31, %v273_v60  ;;  %v258_v12 = vadd.f32 %v587_v52, %v758_v22 }
 0x111   :  { %v319_v62 = vsel %vm77_vm0, %v297_v53, 0.0  ;;  %v276_v2 = vmax.f32 %v218_v54, 0.0  ;;  %v304_v11 = vmul.f32 %v767_v31, %v281_v61  ;;  %v253_v13 = vadd.f32 %v758_v22, %v252_v57 }
 0x112   :  { %311 = vadd.xlane.f32.xlu0 %v310_v63  ;;  %v578_v0 = vpop.f32.mrb[6].mxu0  ;;  %v275_v3 = vmax.f32 %v213_v58, 0.0  ;;  %v343_v4 = vsel %vm77_vm0, %v305_v56, 0.0  ;;  %v316_v18 = vsel %vm77_vm0, %v296_v10, 0.0  ;;  %v284_v20 = vmax.f32 %v258_v12, 0.0 }
 0x113   :  { %320 = vadd.xlane.f32.xlu1 %v319_v62  ;;  %v590_v1 = vpop.f32.mrb[6].mxu1  ;;  %v228_v5 = vadd.f32 %v578_v0, %v758_v22  ;;  %v222_v6 = vpop.f32.mrb[7].mxu0  ;;  %v299_v16 = vmul.f32 %v767_v31, %v276_v2  ;;  %v340_v19 = vsel %vm77_vm0, %v304_v11, 0.0  ;;  %v283_v21 = vmax.f32 %v253_v13, 0.0 }
 0x114   :  { %v262_v7 = vpop.f32.mrb[7].mxu1  ;;  %v223_v8 = vadd.f32 %v758_v22, %v222_v6  ;;  %v298_v17 = vmul.f32 %v767_v31, %v275_v3  ;;  %v268_v23 = vadd.f32 %v590_v1, %v758_v22  ;;  %v307_v29 = vmul.f32 %v767_v31, %v284_v20 }
 0x115   :  { %v278_v14 = vmax.f32 %v228_v5, 0.0  ;;  %v263_v24 = vadd.f32 %v758_v22, %v262_v7  ;;  %v325_v25 = vsel %vm77_vm0, %v299_v16, 0.0  ;;  %v306_v30 = vmul.f32 %v767_v31, %v283_v21 }
 0x116   :  { %335 = vadd.xlane.f32.xlu0 %v334_v9  ;;  %v277_v15 = vmax.f32 %v223_v8, 0.0  ;;  %v322_v26 = vsel %vm77_vm0, %v298_v17, 0.0  ;;  %v286_v32 = vmax.f32 %v268_v23, 0.0  ;;  %v349_v35 = vsel %vm77_vm0, %v307_v29, 0.0 }
 0x117   :  { %344 = vadd.xlane.f32.xlu1 %v343_v4  ;;  %v301_v27 = vmul.f32 %v767_v31, %v278_v14  ;;  %v285_v33 = vmax.f32 %v263_v24, 0.0  ;;  %v346_v36 = vsel %vm77_vm0, %v306_v30, 0.0  ;;  %v392_v41 = vlaneseq }
 0x118   :  { %v300_v28 = vmul.f32 %v767_v31, %v277_v15  ;;  %v309_v37 = vmul.f32 %v767_v31, %v286_v32  ;;  %v823_v48 = vstv %s911_s4  ;;  %s684_s4 = smov [#allocation8]  }
 0x119   :  { %v331_v34 = vsel %vm77_vm0, %v301_v27, 0.0  ;;  %v308_v38 = vmul.f32 %v767_v31, %v285_v33  ;;  %v815_v44 = vand.u32 127, %v392_v41  ;;  %v817_v47 = vshrl.u32 %v392_v41, 7  ;;  %s511_s22 = sshll.u32 %s684_s4, 4  ;;  %s512_s22 = int_to_ptr.vmem [resolvable:$true] %s511_s22 }
 0x11a   :  { %341 = vadd.xlane.f32.xlu0 %v340_v19  ;;  %v328_v22 = vsel %vm77_vm0, %v300_v28, 0.0  ;;  %v355_v39 = vsel %vm77_vm0, %v309_v37, 0.0  ;;  %s652_s23 = scalar_lea.vmem %s512_s22, 16  ;;  %s656_s24 = scalar_lea.vmem %s512_s22, 32 }
 0x11b   :  { %317 = vadd.xlane.f32.xlu1 %v316_v18  ;;  %v352_v40 = vsel %vm77_vm0, %v308_v38, 0.0  ;;  %v398_v31 = vadd.s32 4294967288, %v815_v44  ;;  %v405_v49 = vadd.s32 4294967280, %v815_v44  ;;  %v396_v50 = vsub.s32 %v815_v44, %v817_v47  ;;  %p653_p2 = scmp.ne.s32.totalorder %s512_s22, %s652_s23  ;;  %p657_p3 = scmp.lt.s32.totalorder %s512_s22, %s512_s22 }
 0x11c   :  { %v832_v54 = vadd.s32 4294967224, %v815_v44  ;;  %v412_v55 = vadd.s32 4294967272, %v815_v44  ;;  %v838_v58 = vadd.s32 4294967232, %v815_v44  ;;  %v419_v60 = vadd.s32 4294967264, %v815_v44  ;;  %p658_p4 = scmp.lt.s32.totalorder %s656_s24, %s652_s23 }
 0x11d   :  { %v401_v56 = vsub.s32 %v398_v31, %v817_v47  ;;  %v408_v59 = vsub.s32 %v405_v49, %v817_v47  ;;  %v843_v62 = vadd.s32 4294967208, %v815_v44  ;;  %v846_v0 = vadd.s32 4294967216, %v815_v44 }
 0x11e   :  { %323 = vadd.xlane.f32.xlu0 %v322_v26  ;;  %v426_v2 = vadd.s32 4294967256, %v815_v44  ;;  %v457_v3 = vsub.s32 %v832_v54, %v817_v47  ;;  %v415_v4 = vsub.s32 %v412_v55, %v817_v47  ;;  %v440_v8 = vadd.s32 4294967240, %v815_v44  ;;  %p659_p5 = por %p658_p4, %p657_p3 }
 0x11f   :  { %326 = vadd.xlane.f32.xlu1 %v325_v25  ;;  %v450_v9 = vsub.s32 %v838_v58, %v817_v47  ;;  %v422_v11 = vsub.s32 %v419_v60, %v817_v47  ;;  %v433_v12 = vadd.s32 4294967248, %v815_v44  ;;  %v471_v14 = vsub.s32 %v843_v62, %v817_v47 }
 0x120   :  { %v464_v15 = vsub.s32 %v846_v0, %v817_v47  ;;  %v429_v16 = vsub.s32 %v426_v2, %v817_v47  ;;  %v443_v24 = vsub.s32 %v440_v8, %v817_v47  ;;  %v482_v25 = vadd.s32 4294967192, %v815_v44  ;;  %p660_p6 = pnand %p659_p5, %p653_p2 }
 0x121   :  { %v436_v27 = vsub.s32 %v433_v12, %v817_v47  ;;  %v475_v33 = vadd.s32 4294967200, %v815_v44 }
 0x122   :  { %329 = vadd.xlane.f32.xlu0 %v328_v22  ;;  %v485_v38 = vsub.s32 %v482_v25, %v817_v47 }
 0x123   :  { %332 = vadd.xlane.f32.xlu1 %v331_v34 }
 0x126   :  { %347 = vadd.xlane.f32.xlu0 %v346_v36 }
 0x127   :  { %350 = vadd.xlane.f32.xlu1 %v349_v35 }
 0x12a   :  { %353 = vadd.xlane.f32.xlu0 %v352_v40 }
 0x12b   :  { %356 = vadd.xlane.f32.xlu1 %v355_v39  ;;  %v496_v39 = vadd.s32 4294967176, %v815_v44 }
 0x12d   :  { %v499_v58 = vsub.s32 %v496_v39, %v817_v47 }
 0x19b   :  { %v315_v43 = vpop.xlane.xlu0 %314 }
 0x19c   :  { %v813_v42 = vpop.xlane.xlu1 %338  ;;  %v361_v57 = vadd.f32 %v823_v48, %v315_v43 }
 0x19d   :  { %v369_v37 = vadd.f32 %v823_v48, %v813_v42  ;;  %v478_v42 = vsub.s32 %v475_v33, %v817_v47 }
 0x19e   :  { %v402_v6 = vrot.slane %v361_v57, %v401_v56 }
 0x19f   :  { %v312_v46 = vpop.xlane.xlu0 %311  ;;  %v458_v55 = vrot.slane %v369_v37, %v457_v3 }
 0x1a0   :  { %v321_v45 = vpop.xlane.xlu1 %320  ;;  %v360_v51 = vadd.f32 %v823_v48, %v312_v46 }
 0x1a1   :  { %v363_v7 = vadd.f32 %v823_v48, %v321_v45  ;;  %v489_v45 = vadd.s32 4294967184, %v815_v44 }
 0x1a2   :  { %v397_v61 = vrot.slane %v360_v51, %v396_v50 }
 0x1a3   :  { %v336_v53 = vpop.xlane.xlu0 %335  ;;  %v416_v23 = vrot.slane %v363_v7, %v415_v4 }
 0x1a4   :  { %v829_v52 = vpop.xlane.xlu1 %344  ;;  %v404_v13 = vsel %vm403_vm1, %v402_v6, %v397_v61  ;;  %v368_v34 = vadd.f32 %v823_v48, %v336_v53 }
 0x1a5   :  { %v371_v46 = vadd.f32 %v823_v48, %v829_v52 }
 0x1a6   :  { %v451_v51 = vrot.slane %v368_v34, %v450_v9 }
 0x1a7   :  { %v342_v1 = vpop.xlane.xlu0 %341  ;;  %v472_v60 = vrot.slane %v371_v46, %v471_v14 }
 0x1a8   :  { %v318_v63 = vpop.xlane.xlu1 %317  ;;  %v370_v40 = vadd.f32 %v823_v48, %v342_v1 }
 0x1a9   :  { %v362_v5 = vadd.f32 %v823_v48, %v318_v63 }
 0x1aa   :  { %v465_v52 = vrot.slane %v370_v40, %v464_v15 }
 0x1ab   :  { %v409_v10 = vrot.slane %v362_v5, %v408_v59  ;;  %v324_v18 = vpop.xlane.xlu0 %323  ;;  %v492_v59 = vsub.s32 %v489_v45, %v817_v47 }
 0x1ac   :  { %v327_v17 = vpop.xlane.xlu1 %326  ;;  %v364_v21 = vadd.f32 %v823_v48, %v324_v18 }
 0x1ad   :  { %v411_v19 = vsel %vm410_vm2, %v409_v10, %v404_v13  ;;  %v365_v20 = vadd.f32 %v823_v48, %v327_v17 }
 0x1ae   :  { %v423_v26 = vrot.slane %v364_v21, %v422_v11  ;;  %v418_v29 = vsel %vm417_vm3, %v416_v23, %v411_v19 }
 0x1af   :  { %v430_v28 = vrot.slane %v365_v20, %v429_v16  ;;  %v330_v32 = vpop.xlane.xlu0 %329 }
 0x1b0   :  { %v333_v30 = vpop.xlane.xlu1 %332  ;;  %v425_v22 = vsel %vm424_vm4, %v423_v26, %v418_v29  ;;  %v366_v36 = vadd.f32 %v823_v48, %v330_v32 }
 0x1b1   :  { %v367_v35 = vadd.f32 %v823_v48, %v333_v30  ;;  %v432_v31 = vsel %vm431_vm5, %v430_v28, %v425_v22 }
 0x1b2   :  { %v437_v43 = vrot.slane %v366_v36, %v436_v27 }
 0x1b3   :  { %v444_v41 = vrot.slane %v367_v35, %v443_v24  ;;  %v348_v50 = vpop.xlane.xlu0 %347 }
 0x1b4   :  { %v351_v49 = vpop.xlane.xlu1 %350  ;;  %v439_v53 = vsel %vm438_vm6, %v437_v43, %v432_v31  ;;  %v372_v54 = vadd.f32 %v823_v48, %v348_v50 }
 0x1b5   :  { %v446_v56 = vsel %vm445_vm7, %v444_v41, %v439_v53  ;;  %v373_v44 = vadd.f32 %v823_v48, %v351_v49 }
 0x1b6   :  { %v453_v57 = vsel %vm452_vm8, %v451_v51, %v446_v56  ;;  %v479_v1 = vrot.slane %v372_v54, %v478_v42 }
 0x1b7   :  { %v460_v61 = vsel %vm459_vm9, %v458_v55, %v453_v57  ;;  %v354_v63 = vpop.xlane.xlu0 %353  ;;  %v486_v4 = vrot.slane %v373_v44, %v485_v38 }
 0x1b8   :  { %v357_v62 = vpop.xlane.xlu1 %356  ;;  %v467_v0 = vsel %vm466_vm10, %v465_v52, %v460_v61  ;;  %v374_v3 = vadd.f32 %v823_v48, %v354_v63 }
 0x1b9   :  { %v375_v2 = vadd.f32 %v823_v48, %v357_v62  ;;  %v474_v5 = vsel %vm473_vm11, %v472_v60, %v467_v0 }
 0x1ba   :  { %v481_v47 = vsel %vm480_vm12, %v479_v1, %v474_v5  ;;  %v493_v7 = vrot.slane %v374_v3, %v492_v59 }
 0x1bb   :  { %v500_v6 = vrot.slane %v375_v2, %v499_v58  ;;  %v488_v8 = vsel %vm487_vm13, %v486_v4, %v481_v47 }
 0x1bc   :  { %v495_v9 = vsel %vm494_vm14, %v493_v7, %v488_v8 }
 0x1bd   :  { %v502_v10 = vsel %vm501_vm15, %v500_v6, %v495_v9 }
 0x1be   :  { %504 = vst [vmem:[#allocation8] sm:$0x1] %v502_v10 }
 0x1bf   :  { %663 = shalt.err (!%p660_p6)
}
 0x1c0   :  { %s664_s27 = scalar_lea.hbm %s912_s5, 16 }
 0x1c1   :  { %p665_p7 = scmp.ne.s32.totalorder %s912_s5, %s664_s27  ;;  %p668_p8 = scmp.lt.u32.totalorder %s664_s27, %s912_s5 }
 0x1c3   :  { %p670_p9 = pnand %p668_p8, %p665_p7 }
 0x1c5   :  { %673 = shalt.err (!%p670_p9)
}
 0x1c6   :  { %514 = dma.vmem_to_hbm [thread:$0]  %s512_s22, 16, %s912_s5, [#allocation5]  }
 0x1c7   :  { %678 = dma.done.wait [#allocation5], 16  }
 0x1c8   :  { %679 = vsyncadd [#allocation5], 4294967280 }
 0x1c9   :  { %518 = vsyncpa [#allocation4], 1 }
 0x1ca   :  { %519 = vsyncpa [#allocation7], 1 }
 0x1cb   :  { %520 = vsyncpa [#allocation5], 1 }

</bundles_post_ra>
